<compile_context>
chip_gen: v7x
topology: tpu7x:2x2x1
jax: 0.10.0
libtpu: 0.0.40
codegen_flags: <defaults>
</compile_context>

<pallas_src>
import jax
import jax.numpy as jnp
from jax.experimental import pallas as pl
from jax.experimental.pallas import tpu as pltpu

LANE = 128
NEG_INF = -1e30


def _round_up(x, m):
    return ((x + m - 1) // m) * m


# --------------------------------------------------------------------------------------
# Kernels
# --------------------------------------------------------------------------------------

def proj1_kernel(x_ref, w1_ref, xw_ref):
    # XW1[rows] = X[rows] @ W1      (bf16 x bf16 -> f32 acc -> bf16 store)
    xw = jnp.dot(x_ref[...], w1_ref[...], preferred_element_type=jnp.float32)
    xw_ref[...] = xw.astype(xw_ref.dtype)


def agg1_proj2_kernel(a_ref, xw_ref, b1_ref, w2_ref, hw2_ref):
    # H[rows]   = relu(A_hat[rows, :] @ XW1 + b1)        (f32 accumulate / f32 ReLU)
    # HW2[rows] = H[rows] @ W2                            (fused second projection)
    h = jnp.dot(a_ref[...], xw_ref[...], preferred_element_type=jnp.float32)
    h = jnp.maximum(h + b1_ref[...], 0.0)
    # Dropout: eval-mode identity (see TODO at top of file).
    hw2 = jnp.dot(h.astype(w2_ref.dtype), w2_ref[...],
                  preferred_element_type=jnp.float32)
    hw2_ref[...] = hw2.astype(hw2_ref.dtype)


def agg2_logsoftmax_kernel(a_ref, hw2_ref, b2_ref, out_ref):
    # OUT[rows] = log_softmax(A_hat[rows, :] @ HW2 + b2)
    # Padded class lanes carry b2 = -1e30, so they vanish under max / logsumexp.
    z = jnp.dot(a_ref[...], hw2_ref[...], preferred_element_type=jnp.float32)
    z = z + b2_ref[...]
    m = jnp.max(z, axis=1, keepdims=True)
    z = z - m
    lse = jnp.log(jnp.sum(jnp.exp(z), axis=1, keepdims=True))
    out_ref[...] = z - lse


# --------------------------------------------------------------------------------------
# Wrapper
# --------------------------------------------------------------------------------------

def gcn_forward(a_hat, x, w1, b1, w2, b2, *, tm_target=256, vmem_limit_bytes=48 << 20):
    """Forward pass. a_hat: [N,N] f32 normalized adjacency, x: [N,F], w1: [F,HID],
    b1: [1,HID], w2: [HID,C], b2: [1,C]. Returns [N,C] f32 log-probabilities."""
    n, f_in = x.shape
    hid = w1.shape[1]
    c = w2.shape[1]

    # Padded sizes: lane-dense (128) last dims; row tile TM divides the padded node count.
    n_pad = _round_up(n, LANE)
    tm = min(tm_target, n_pad)
    n_pad = _round_up(n_pad, tm)
    f_pad = _round_up(f_in, LANE)
    hid_pad = _round_up(hid, LANE)
    c_pad = _round_up(c, LANE)

    # Pad + cast operands. bf16 halves HBM traffic for the dominant N^2 adjacency operand;
    # degree normalization was already done in f32 before this cast.
    a_p = jnp.zeros((n_pad, n_pad), jnp.bfloat16).at[:n, :n].set(a_hat.astype(jnp.bfloat16))
    x_p = jnp.zeros((n_pad, f_pad), jnp.bfloat16).at[:n, :f_in].set(x.astype(jnp.bfloat16))
    w1_p = jnp.zeros((f_pad, hid_pad), jnp.bfloat16).at[:f_in, :hid].set(w1.astype(jnp.bfloat16))
    w2_p = jnp.zeros((hid_pad, c_pad), jnp.bfloat16).at[:hid, :c].set(w2.astype(jnp.bfloat16))
    b1_p = jnp.zeros((1, hid_pad), jnp.float32).at[:, :hid].set(b1.astype(jnp.float32))
    # Padded class lanes get a -inf-like bias so log_softmax ignores them.
    b2_p = jnp.full((1, c_pad), NEG_INF, jnp.float32).at[:, :c].set(b2.astype(jnp.float32))

    grid = (n_pad // tm,)
    # Node-row axis is embarrassingly parallel (megacore sharding on v7x).
    # vmem_limit kept well under v7x's 64 MiB; raise tm_target / limit on v5e/v6e (128 MiB)
    # for larger graphs.
    cparams = pltpu.CompilerParams(
        dimension_semantics=("parallel",),
        vmem_limit_bytes=vmem_limit_bytes,
    )

    def row_spec(width):
        return pl.BlockSpec((tm, width), lambda i: (i, 0))

    def full_spec(shape):
        nd = len(shape)
        return pl.BlockSpec(shape, lambda i, _nd=nd: (0,) * _nd)

    # ---- pass 1: XW1 = X @ W1 ----------------------------------------------------------
    xw1 = pl.pallas_call(
        proj1_kernel,
        out_shape=jax.ShapeDtypeStruct((n_pad, hid_pad), jnp.bfloat16),
        grid=grid,
        in_specs=[row_spec(f_pad), full_spec((f_pad, hid_pad))],
        out_specs=row_spec(hid_pad),
        compiler_params=cparams,
    )(x_p, w1_p)

    # ---- pass 2: HW2 = relu(A_hat @ XW1 + b1) @ W2 --------------------------------------
    hw2 = pl.pallas_call(
        agg1_proj2_kernel,
        out_shape=jax.ShapeDtypeStruct((n_pad, c_pad), jnp.bfloat16),
        grid=grid,
        in_specs=[row_spec(n_pad),
                  full_spec((n_pad, hid_pad)),
                  full_spec((1, hid_pad)),
                  full_spec((hid_pad, c_pad))],
        out_specs=row_spec(c_pad),
        compiler_params=cparams,
    )(a_p, xw1, b1_p, w2_p)

    # ---- pass 3: OUT = log_softmax(A_hat @ HW2 + b2) ------------------------------------
    out_p = pl.pallas_call(
        agg2_logsoftmax_kernel,
        out_shape=jax.ShapeDtypeStruct((n_pad, c_pad), jnp.float32),
        grid=grid,
        in_specs=[row_spec(n_pad),
                  full_spec((n_pad, c_pad)),
                  full_spec((1, c_pad))],
        out_specs=row_spec(c_pad),
        compiler_params=cparams,
    )(a_p, hw2, b2_p)

    return out_p[:n, :c]


def normalized_adjacency(edge_index, num_nodes):
    """Dense GCN-normalized adjacency: D^{-1/2} (A + I) D^{-1/2}, computed in f32.

    edge_index[0] = source nodes j, edge_index[1] = target nodes i
    (PyG 'source_to_target' flow: messages flow j -> i).
    """
    src, dst = edge_index[0], edge_index[1]
    a = jnp.zeros((num_nodes, num_nodes), jnp.float32)
    a = a.at[dst, src].add(1.0)                        # A[i, j] = 1 for edge j -> i
    a = a + jnp.eye(num_nodes, dtype=jnp.float32)      # add self-loops
    deg = jnp.sum(a, axis=1)                           # in-degree incl. self-loop
    dinv = jnp.where(deg > 0, 1.0 / jnp.sqrt(deg), 0.0)
    return a * dinv[:, None] * dinv[None, :]


def gcn_reference(a_hat, x, w1, b1, w2, b2):
    """Pure-JAX f32 reference of the same forward pass."""
    h = a_hat @ (x @ w1) + b1
    h = jnp.maximum(h, 0.0)
    h2 = a_hat @ (h @ w2) + b2
    m = jnp.max(h2, axis=1, keepdims=True)
    z = h2 - m
    return z - jnp.log(jnp.sum(jnp.exp(z), axis=1, keepdims=True))


if __name__ == "__main__":
    # Small synthetic graph consistent with GCN(num_node_features, num_classes).
    N = 8        # nodes
    F_IN = 8     # num_node_features
    HID = 16     # GCNConv(num_node_features, 16)
    C = 4        # num_classes

    key = jax.random.PRNGKey(0)
    k_x, k_w1, k_w2 = jax.random.split(key, 3)

    x = jax.random.normal(k_x, (N, F_IN), jnp.float32)

    # Undirected ring graph, both edge directions listed (like PyG datasets).
    fwd = jnp.arange(N, dtype=jnp.int32)
    nxt = (fwd + 1) % N
    edge_index = jnp.stack(
        [jnp.concatenate([fwd, nxt]), jnp.concatenate([nxt, fwd])], axis=0
    )  # [2, 2N]

    # Deterministic (glorot-scaled) parameter init; biases zero, as in GCNConv.
    w1 = jax.random.normal(k_w1, (F_IN, HID), jnp.float32) * (1.0 / jnp.sqrt(F_IN))
    b1 = jnp.zeros((1, HID), jnp.float32)
    w2 = jax.random.normal(k_w2, (HID, C), jnp.float32) * (1.0 / jnp.sqrt(HID))
    b2 = jnp.zeros((1, C), jnp.float32)

    a_hat = normalized_adjacency(edge_index, N)

    out = gcn_forward(a_hat, x, w1, b1, w2, b2)
    out = jax.block_until_ready(out)

    assert out.shape == (N, C), out.shape
    # log_softmax rows must exponentiate-sum to 1.
    row_sums = jnp.sum(jnp.exp(out), axis=1)
    assert bool(jnp.all(jnp.abs(row_sums - 1.0) < 1e-4)), row_sums
    # Match f32 reference within bf16 matmul tolerance.
    ref = gcn_reference(a_hat, x, w1, b1, w2, b2)
    max_err = float(jnp.max(jnp.abs(out - ref)))
    assert max_err < 1e-1, max_err

    print("KERNEL_OK")
</pallas_src>

<mosaic_0001>
module attributes {stable_mosaic.version = 11 : i64} {
  func.func @proj1_kernel(%arg0: i32, %arg1: memref<128x128xbf16, #tpu.memory_space<vmem>>, %arg2: memref<128x128xbf16, #tpu.memory_space<vmem>>, %arg3: memref<128x128xbf16, #tpu.memory_space<vmem>>) attributes {dimension_semantics = [#tpu.dimension_semantics<parallel>], iteration_bounds = array<i64: 1>, scalar_prefetch = 0 : i64, scratch_operands = 0 : i64, tpu.core_type = #tpu.core_type<tc>, window_params = [{transform_indices = @transform_0, window_bounds = array<i64: 128, 128>}, {pipeline_mode = #tpu.pipeline_mode<synchronous>, transform_indices = @transform_1, window_bounds = array<i64: 128, 128>}, {transform_indices = @transform_2, window_bounds = array<i64: 128, 128>}]} {
    %c0 = arith.constant 0 : index
    %c0_0 = arith.constant 0 : index
    %0 = vector.load %arg1[%c0, %c0_0] : memref<128x128xbf16, #tpu.memory_space<vmem>>, vector<128x128xbf16>
    %c0_1 = arith.constant 0 : index
    %c0_2 = arith.constant 0 : index
    %1 = vector.load %arg2[%c0_1, %c0_2] : memref<128x128xbf16, #tpu.memory_space<vmem>>, vector<128x128xbf16>
    %cst = arith.constant dense<0.000000e+00> : vector<128x128xf32>
    %2 = tpu.matmul %0, %1, %cst {dimension_numbers = #tpu.dot_dimension_numbers<[1], [0], [0], [1], [0, 0, 1, 1], [], []>} : vector<128x128xbf16>, vector<128x128xbf16>, vector<128x128xf32> -> vector<128x128xf32>
    %3 = arith.truncf %2 : vector<128x128xf32> to vector<128x128xbf16>
    %c0_3 = arith.constant 0 : index
    %c0_4 = arith.constant 0 : index
    %4 = vector.load %arg3[%c0_3, %c0_4] : memref<128x128xbf16, #tpu.memory_space<vmem>>, vector<128x128xbf16>
    tpu.vector_store %arg3[%c0_3, %c0_4], %3 {strides = array<i32>} : memref<128x128xbf16, #tpu.memory_space<vmem>>, vector<128x128xbf16>,
    return
  }
  func.func @transform_0(%arg0: i32) -> (i32, i32) {
    %c0_i32 = arith.constant 0 : i32
    %c0_i32_0 = arith.constant 0 : i32
    return %arg0, %c0_i32 : i32, i32
  }
  func.func @transform_1(%arg0: i32) -> (i32, i32) {
    %c0_i32 = arith.constant 0 : i32
    %c0_i32_0 = arith.constant 0 : i32
    %c0_i32_1 = arith.constant 0 : i32
    return %c0_i32, %c0_i32_0 : i32, i32
  }
  func.func @transform_2(%arg0: i32) -> (i32, i32) {
    %c0_i32 = arith.constant 0 : i32
    %c0_i32_0 = arith.constant 0 : i32
    return %arg0, %c0_i32 : i32, i32
  }
}

</mosaic_0001>

<bundles_post_ra>
// kernel: tpu_custom_call.1
= control target key start
LH: loop header
LB: loop body
LE: loop exit
PB: predicated region body
PF: predicated region fallthrough
CT: control target
= control target key end

     0   :  { %7 = vsyncpa [#allocation3], 0  ;;  %s681_s0 = inlined_call_operand.hbm [shape: bf16[128,128], index: 0, kind: input, shape index: {}]   ;;  %s682_s1 = inlined_call_operand.hbm [shape: bf16[128,128], index: 1, kind: input, shape index: {}]   ;;  %s683_s2 = inlined_call_operand.hbm [shape: bf16[128,128], index: 2, kind: output, shape index: {}]  }
   0x1   :  { %8 = vsyncpa [#allocation6], 0 }
   0x2   :  { %9 = vsyncpa [#allocation4], 0  ;;  %s616_s9 = smov [#allocation2]   ;;  %s544_s13 = scalar_lea.hbm %s681_s0, 1024 }
   0x3   :  { %s15_s10 = sshll.u32 %s616_s9, 4  ;;  %p545_p0 = scmp.ne.s32.totalorder %s681_s0, %s544_s13  ;;  %s16_s10 = int_to_ptr.vmem [resolvable:$true] %s15_s10 }
   0x4   :  { %p548_p1 = scmp.lt.u32.totalorder %s544_s13, %s681_s0 }
   0x6   :  { %p550_p2 = pnand %p548_p1, %p545_p0 }
   0x8   :  { %553 = shalt.err (!%p550_p2)
}
   0x9   :  { %s554_s18 = scalar_lea.vmem %s16_s10, 1024  ;;  %p559_p4 = scmp.lt.s32.totalorder %s16_s10, %s16_s10 }
   0xa   :  { %p555_p3 = scmp.ne.s32.totalorder %s16_s10, %s554_s18  ;;  %p560_p5 = scmp.lt.s32.totalorder %s554_s18, %s554_s18 }
   0xc   :  { %p561_p6 = por %p560_p5, %p559_p4 }
   0xe   :  { %p562_p7 = pnand %p561_p6, %p555_p3 }
  0x10   :  { %565 = shalt.err (!%p562_p7)
}
  0x11   :  { %s617_s19 = smov 64   ;;  %s618_s20 = smov 4  }
  0x12   :  { %21 = dma.hbm_to_vmem [thread:$0]  %s681_s0, 1024, %s16_s10, [#allocation3], %s617_s19, %s617_s19, %s618_s20  }
  0x13   :  { %s619_s23 = smov [#allocation5]   ;;  %s566_s27 = scalar_lea.hbm %s682_s1, 1024 }
  0x14   :  { %s27_s24 = sshll.u32 %s619_s23, 4  ;;  %p567_p8 = scmp.ne.s32.totalorder %s682_s1, %s566_s27  ;;  %s28_s24 = int_to_ptr.vmem [resolvable:$true] %s27_s24 }
  0x15   :  { %p570_p9 = scmp.lt.u32.totalorder %s566_s27, %s682_s1 }
  0x17   :  { %p572_p10 = pnand %p570_p9, %p567_p8 }
  0x19   :  { %575 = shalt.err (!%p572_p10)
}
  0x1a   :  { %s576_s4 = scalar_lea.vmem %s28_s24, 1024  ;;  %p581_p12 = scmp.lt.s32.totalorder %s28_s24, %s28_s24 }
  0x1b   :  { %p577_p11 = scmp.ne.s32.totalorder %s28_s24, %s576_s4  ;;  %p582_p13 = scmp.lt.s32.totalorder %s576_s4, %s576_s4 }
  0x1d   :  { %p583_p0 = por %p582_p13, %p581_p12 }
  0x1f   :  { %p584_p1 = pnand %p583_p0, %p577_p11 }
  0x21   :  { %587 = shalt.err (!%p584_p1)
}
  0x22   :  { %33 = dma.hbm_to_vmem [thread:$0]  %s682_s1, 1024, %s28_s24, [#allocation6], %s617_s19, %s617_s19, %s618_s20  }
  0x23   :  { %610 = dma.done.wait [#allocation3], 1024  }
  0x24   :  { %611 = vsyncadd [#allocation3], 4294966272 }
  0x25   :  { %612 = dma.done.wait [#allocation6], 1024  }
  0x26   :  { %613 = vsyncadd [#allocation6], 4294966272  ;;  %v528_v0 = vld [vmem:[#allocation5] sm:$0xff]   ;;  %v529_v1 = vld [vmem:[#allocation5 + $0x8] sm:$0xff]   ;;  %s620_s1 = smov [#allocation7]  }
  0x27   :  { %475 = vmatprep.subr.bf16.mxu0 %v528_v0  ;;  %507 = vmatprep.subr.bf16.mxu1 %v528_v0  ;;  %v530_v2 = vld [vmem:[#allocation5 + $0x10] sm:$0xff]   ;;  %v531_v3 = vld [vmem:[#allocation5 + $0x18] sm:$0xff]   ;;  %v536_v4 = vld [vmem:[#allocation2] sm:$0xff]   ;;  %s351_s6 = sshll.u32 %s620_s1, 4  ;;  %s352_s6 = int_to_ptr.vmem [resolvable:$true] %s351_s6 }
  0x28   :  { %476 = vmatpush3.bf16.msra.mxu0 %v528_v0  ;;  %515 = vmatpush3.bf16.msra.mxu1 %v528_v0  ;;  %v537_v5 = vld [vmem:[#allocation2 + $0x20] sm:$0xff]   ;;  %v533_v7 = vld [vmem:[#allocation5 + $0x28] sm:$0xff]   ;;  %v534_v8 = vld [vmem:[#allocation5 + $0x30] sm:$0xff]   ;;  %s588_s7 = scalar_lea.vmem %s352_s6, 1024  ;;  %p593_p3 = scmp.lt.s32.totalorder %s352_s6, %s352_s6 }
  0x29   :  { %477 = vmatprep.subr.bf16.mxu0 %v529_v1  ;;  %508 = vmatprep.subr.bf16.mxu1 %v529_v1  ;;  %v532_v6 = vld [vmem:[#allocation5 + $0x20] sm:$0xff]   ;;  %v535_v9 = vld [vmem:[#allocation5 + $0x38] sm:$0xff]   ;;  %v538_v10 = vld [vmem:[#allocation2 + $0x8] sm:$0xff]   ;;  %p589_p2 = scmp.ne.s32.totalorder %s352_s6, %s588_s7  ;;  %p594_p4 = scmp.lt.s32.totalorder %s588_s7, %s588_s7 }
  0x2a   :  { %491 = vmatprep.mubr.bf16.mxu0 %v536_v4  ;;  %499 = vmatprep.mubr.bf16.mxu1 %v537_v5  ;;  %v539_v11 = vld [vmem:[#allocation2 + $0x28] sm:$0xff]   ;;  %v540_v12 = vld [vmem:[#allocation2 + $0x10] sm:$0xff]   ;;  %v542_v14 = vld [vmem:[#allocation2 + $0x18] sm:$0xff]  }
  0x2b   :  { %v541_v13 = vld [vmem:[#allocation2 + $0x30] sm:$0xff]   ;;  %v543_v15 = vld [vmem:[#allocation2 + $0x38] sm:$0xff]   ;;  %p595_p5 = por %p594_p4, %p593_p3 }
  0x2c   :  { %478 = vmatpush3.bf16.msra.mxu0 %v529_v1  ;;  %516 = vmatpush3.bf16.msra.mxu1 %v529_v1 }
  0x2d   :  { %479 = vmatprep.subr.bf16.mxu0 %v530_v2  ;;  %509 = vmatprep.subr.bf16.mxu1 %v530_v2  ;;  %p596_p6 = pnand %p595_p5, %p589_p2 }
  0x30   :  { %480 = vmatpush3.bf16.msra.mxu0 %v530_v2  ;;  %517 = vmatpush3.bf16.msra.mxu1 %v530_v2 }
  0x31   :  { %481 = vmatprep.subr.bf16.mxu0 %v531_v3  ;;  %510 = vmatprep.subr.bf16.mxu1 %v531_v3 }
  0x34   :  { %482 = vmatpush3.bf16.msra.mxu0 %v531_v3  ;;  %518 = vmatpush3.bf16.msra.mxu1 %v531_v3 }
  0x35   :  { %483 = vmatprep.subr.bf16.mxu0 %v532_v6  ;;  %511 = vmatprep.subr.bf16.mxu1 %v532_v6 }
  0x38   :  { %484 = vmatpush3.bf16.msra.mxu0 %v532_v6  ;;  %519 = vmatpush3.bf16.msra.mxu1 %v532_v6 }
  0x39   :  { %485 = vmatprep.subr.bf16.mxu0 %v533_v7  ;;  %512 = vmatprep.subr.bf16.mxu1 %v533_v7 }
  0x3c   :  { %486 = vmatpush3.bf16.msra.mxu0 %v533_v7  ;;  %520 = vmatpush3.bf16.msra.mxu1 %v533_v7 }
  0x3d   :  { %487 = vmatprep.subr.bf16.mxu0 %v534_v8  ;;  %513 = vmatprep.subr.bf16.mxu1 %v534_v8 }
  0x40   :  { %488 = vmatpush3.bf16.msra.mxu0 %v534_v8  ;;  %521 = vmatpush3.bf16.msra.mxu1 %v534_v8 }
  0x41   :  { %489 = vmatprep.subr.bf16.mxu0 %v535_v9  ;;  %514 = vmatprep.subr.bf16.mxu1 %v535_v9 }
  0x44   :  { %490 = vmatpush3.bf16.msra.mxu0 %v535_v9  ;;  %522 = vmatpush3.bf16.msra.mxu1 %v535_v9 }
  0x47   :  { %492 = vmatmul.mubr.bf16.vlgmr.msra.gmra.mrb[0].mxu0 %v538_v10  ;;  %500 = vmatmul.mubr.bf16.vlgmr.msra.gmra.mrb[0].mxu1 %v539_v11 }
  0x48   :  { %495 = vmatprep.mubr.bf16.mxu0 %v540_v12  ;;  %503 = vmatprep.mubr.bf16.mxu1 %v541_v13 }
  0x4f   :  { %496 = vmatmul.mubr.bf16.gmra.mrb[4].mxu0 %v542_v14  ;;  %504 = vmatmul.mubr.bf16.gmra.mrb[4].mxu1 %v543_v15 }
 0x11a   :  { %v493_v16 = vpop.f32.mrb[0].mxu0  ;;  %v501_v17 = vpop.f32.mrb[0].mxu1 }
 0x11b   :  { %v203_v18 = vpop.f32.mrb[1].mxu0  ;;  %v235_v19 = vpop.f32.mrb[1].mxu1 }
 0x11c   :  { %v494_v20 = vpop.f32.mrb[2].mxu0  ;;  %v502_v21 = vpop.f32.mrb[2].mxu1 }
 0x11d   :  { %v420_v22 = vpack.c.bf16 %v494_v20, %v493_v16  ;;  %v440_v23 = vpack.c.bf16 %v502_v21, %v501_v17  ;;  %v206_v24 = vpop.f32.mrb[3].mxu0  ;;  %v238_v25 = vpop.f32.mrb[3].mxu1 }
 0x11e   :  { %v415_v26 = vpack.c.bf16 %v206_v24, %v203_v18  ;;  %v435_v27 = vpack.c.bf16 %v238_v25, %v235_v19 }
 0x11f   :  { %452 = vst [vmem:[#allocation7 + $0x8] sm:$0xff] %v420_v22   ;;  %456 = vst [vmem:[#allocation7 + $0x28] sm:$0xff] %v440_v23  }
 0x120   :  { %416 = vst [vmem:[#allocation7] sm:$0xff] %v415_v26   ;;  %455 = vst [vmem:[#allocation7 + $0x20] sm:$0xff] %v435_v27  }
 0x122   :  { %v497_v28 = vpop.f32.mrb[4].mxu0  ;;  %v505_v29 = vpop.f32.mrb[4].mxu1 }
 0x123   :  { %v219_v30 = vpop.f32.mrb[5].mxu0  ;;  %v251_v31 = vpop.f32.mrb[5].mxu1 }
 0x124   :  { %v498_v32 = vpop.f32.mrb[6].mxu0  ;;  %v506_v33 = vpop.f32.mrb[6].mxu1 }
 0x125   :  { %v430_v34 = vpack.c.bf16 %v498_v32, %v497_v28  ;;  %v450_v35 = vpack.c.bf16 %v506_v33, %v505_v29  ;;  %v222_v36 = vpop.f32.mrb[7].mxu0  ;;  %v254_v37 = vpop.f32.mrb[7].mxu1 }
 0x126   :  { %v425_v38 = vpack.c.bf16 %v222_v36, %v219_v30  ;;  %v445_v39 = vpack.c.bf16 %v254_v37, %v251_v31 }
 0x127   :  { %454 = vst [vmem:[#allocation7 + $0x18] sm:$0xff] %v430_v34   ;;  %458 = vst [vmem:[#allocation7 + $0x38] sm:$0xff] %v450_v35  }
 0x128   :  { %453 = vst [vmem:[#allocation7 + $0x10] sm:$0xff] %v425_v38   ;;  %457 = vst [vmem:[#allocation7 + $0x30] sm:$0xff] %v445_v39  }
 0x129   :  { %599 = shalt.err (!%p596_p6)
}
 0x12a   :  { %s600_s10 = scalar_lea.hbm %s683_s2, 1024 }
 0x12b   :  { %p601_p7 = scmp.ne.s32.totalorder %s683_s2, %s600_s10  ;;  %p604_p8 = scmp.lt.u32.totalorder %s600_s10, %s683_s2 }
 0x12d   :  { %p606_p9 = pnand %p604_p8, %p601_p7 }
 0x12f   :  { %609 = shalt.err (!%p606_p9)
}
 0x130   :  { %357 = dma.vmem_to_hbm [thread:$0]  %s352_s6, 1024, %s683_s2, [#allocation4], %s617_s19, %s617_s19, %s618_s20  }
 0x131   :  { %614 = dma.done.wait [#allocation4], 1024  }
 0x132   :  { %615 = vsyncadd [#allocation4], 4294966272 }
 0x133   :  { %361 = vsyncpa [#allocation3], 1 }
 0x134   :  { %362 = vsyncpa [#allocation6], 1 }
 0x135   :  { %363 = vsyncpa [#allocation4], 1 }

</bundles_post_ra>
